<compile_context>
chip_gen: v5e
topology: v5e:2x2
jax: 0.10.0
libtpu: 0.0.40
codegen_flags: <defaults>
</compile_context>

<pallas_src>
import jax
import jax.numpy as jnp
from jax import lax
from jax.experimental import pallas as pl
from jax.experimental.pallas import tpu as pltpu


def _cam_energy_kernel(gamma_ref, x_ref, attn_ref, acc_ref):
    """Accumulate energy = X @ X^T over N tiles; finalize gamma * softmax.

    gamma_ref: (1,) f32 scalar in SMEM.
    x_ref:     (1, C, tn) input tile (native dtype).
    attn_ref:  (1, C, C) output block (input dtype), resident across the N axis.
    acc_ref:   (C, C) f32 VMEM scratch accumulator.
    """
    j = pl.program_id(1)

    @pl.when(j == 0)
    def _():
        acc_ref[...] = jnp.zeros_like(acc_ref)

    x = x_ref[0]  # (C, tn) native dtype; f32 accumulation on the MXU.
    # energy_tile = x @ x^T without materializing the transpose.
    acc_ref[...] += lax.dot_general(
        x, x,
        dimension_numbers=(((1,), (1,)), ((), ())),
        preferred_element_type=jnp.float32,
    )

    @pl.when(j == pl.num_programs(1) - 1)
    def _():
        energy = acc_ref[...]  # (C, C) f32
        # softmax(rowmax(energy) - energy) == exp(rowmin(energy) - energy) / sum.
        p = jnp.exp(jnp.min(energy, axis=-1, keepdims=True) - energy)
        # Exact divide: the approximate reciprocal is not accurate enough here.
        attn = p / jnp.sum(p, axis=-1, keepdims=True)
        attn_ref[0] = (gamma_ref[0] * attn).astype(attn_ref.dtype)


def _cam_apply_kernel(attn_ref, x_ref, o_ref):
    """out_tile = attention' @ x_tile + x_tile  (gamma already folded in)."""
    x = x_ref[0]  # (C, tn) native dtype
    out = jnp.dot(attn_ref[0], x, preferred_element_type=jnp.float32)
    o_ref[0] = (out + x.astype(jnp.float32)).astype(o_ref.dtype)


def _vmem_budget_bytes():
    """~75% of this generation's per-core VMEM (v5e/v6e: 128 MiB, v7x: 64 MiB)."""
    try:
        cap = int(pltpu.get_tpu_info().vmem_capacity_bytes)
    except Exception:
        cap = 64 << 20  # conservative (v7x-sized) fallback, e.g. interpret mode
    return (cap * 3) // 4


def _choose_tiling(n, c, itemsize, budget):
    """Largest lane-aligned N tile whose per-phase VMEM footprint fits."""
    n_pad = -(-n // 128) * 128  # pad N to a lane multiple
    margin = 4 << 20

    def fits(tn):
        phase1 = 2 * c * tn * itemsize + c * c * 4 + 2 * c * c * itemsize
        phase2 = 2 * c * c * itemsize + 4 * c * tn * itemsize
        return max(phase1, phase2) + margin <= budget

    for tn in (2048, 1024, 512, 256, 128):
        if tn <= n_pad and n_pad % tn == 0 and fits(tn):
            return tn, n_pad
    return 128, n_pad


@jax.jit
def cam_forward(x, gamma):
    """x: (B, C, H, W) array (NCHW, matching the PyTorch module). gamma: (1,)."""
    b, c, h, w = x.shape
    n = h * w
    isz = jnp.dtype(x.dtype).itemsize
    budget = _vmem_budget_bytes()
    tn, n_pad = _choose_tiling(n, c, isz, budget)
    n_tiles = n_pad // tn

    x_flat = x.reshape(b, c, n)
    if n_pad != n:
        # Zero columns contribute nothing to X @ X^T or attention @ X.
        x_flat = jnp.pad(x_flat, ((0, 0), (0, 0), (0, n_pad - n)))

    gamma = gamma.astype(jnp.float32)

    # ---- Phase 1: attention' = gamma * softmax(rowmax(XX^T) - XX^T) --------
    attn = pl.pallas_call(
        _cam_energy_kernel,
        out_shape=jax.ShapeDtypeStruct((b, c, c), x.dtype),
        grid_spec=pltpu.PrefetchScalarGridSpec(
            num_scalar_prefetch=0,
            grid=(b, n_tiles),
            in_specs=[
                pl.BlockSpec(memory_space=pltpu.MemorySpace.SMEM),   # gamma (1,)
                pl.BlockSpec((1, c, tn), lambda i, j: (i, 0, j)),    # x tile
            ],
            out_specs=pl.BlockSpec((1, c, c), lambda i, j: (i, 0, 0)),
            scratch_shapes=[pltpu.VMEM((c, c), jnp.float32)],
        ),
        compiler_params=pltpu.CompilerParams(
            dimension_semantics=("parallel", "arbitrary"),
            vmem_limit_bytes=budget,
        ),
        cost_estimate=pl.CostEstimate(
            flops=2 * b * c * c * n_pad,
            transcendentals=b * c * c,
            bytes_accessed=b * c * n_pad * isz + b * c * c * isz,
        ),
    )(gamma, x_flat)

    # ---- Phase 2: out = attention' @ X + X ----------------------------------
    out_flat = pl.pallas_call(
        _cam_apply_kernel,
        out_shape=jax.ShapeDtypeStruct((b, c, n_pad), x.dtype),
        grid_spec=pltpu.PrefetchScalarGridSpec(
            num_scalar_prefetch=0,
            grid=(b, n_tiles),
            in_specs=[
                pl.BlockSpec((1, c, c), lambda i, j: (i, 0, 0)),     # attention'
                pl.BlockSpec((1, c, tn), lambda i, j: (i, 0, j)),    # x tile
            ],
            out_specs=pl.BlockSpec((1, c, tn), lambda i, j: (i, 0, j)),
        ),
        compiler_params=pltpu.CompilerParams(
            dimension_semantics=("parallel", "parallel"),
            vmem_limit_bytes=budget,
        ),
        cost_estimate=pl.CostEstimate(
            flops=2 * b * c * c * n_pad,
            transcendentals=0,
            bytes_accessed=b * c * c * isz + 2 * b * c * n_pad * isz,
        ),
        # No input_output_aliases: x_flat generally aliases the (undonated) jit
        # parameter, so aliasing would only force XLA to insert a full copy.
    )(attn, x_flat)

    if n_pad != n:
        out_flat = out_flat[:, :, :n]
    return out_flat.reshape(b, c, h, w)


def cam_reference(x, gamma):
    """Pure-JAX reference mirroring the PyTorch forward (f32 math)."""
    b, c, h, w = x.shape
    xf = x.reshape(b, c, h * w).astype(jnp.float32)
    energy = jnp.einsum("bcn,bdn->bcd", xf, xf, precision=lax.Precision.HIGHEST)
    e_new = jnp.max(energy, axis=-1, keepdims=True) - energy
    attn = jax.nn.softmax(e_new, axis=-1)
    out = jnp.einsum("bcd,bdn->bcn", attn, xf, precision=lax.Precision.HIGHEST)
    out = out.reshape(b, c, h, w)
    return (gamma[0] * out + x.astype(jnp.float32)).astype(x.dtype)


if __name__ == "__main__":
    key = jax.random.PRNGKey(0)
    B, C, H, W = 2, 4, 16, 16
    x = jax.random.normal(key, (B, C, H, W), dtype=jnp.float32)

    # Parameter from CAM.__init__: gamma = zeros(1)  (deterministic init).
    gamma = jnp.zeros((1,), dtype=jnp.float32)
    out = jax.block_until_ready(cam_forward(x, gamma))
    ref = cam_reference(x, gamma)
    assert out.shape == x.shape and out.dtype == x.dtype
    assert jnp.allclose(out, ref, atol=1e-5, rtol=1e-5)

    # Exercise the attention path with a non-zero gamma (exact f32 softmax now).
    gamma_nz = jnp.full((1,), 0.5, dtype=jnp.float32)
    out_nz = jax.block_until_ready(cam_forward(x, gamma_nz))
    ref_nz = cam_reference(x, gamma_nz)
    assert jnp.allclose(out_nz, ref_nz, atol=2e-3, rtol=2e-3)

    print("KERNEL_OK")
</pallas_src>

<mosaic_0001>
module attributes {stable_mosaic.version = 11 : i64} {
  func.func @_cam_energy_kernel(%arg0: i32, %arg1: i32, %arg2: memref<1xf32, #tpu.memory_space<smem>>, %arg3: memref<1x4x256xf32, #tpu.memory_space<vmem>>, %arg4: memref<1x4x4xf32, #tpu.memory_space<vmem>>, %arg5: memref<4x4xf32, #tpu.memory_space<vmem>>) attributes {dimension_semantics = [#tpu.dimension_semantics<parallel>, #tpu.dimension_semantics<arbitrary>], iteration_bounds = array<i64: 2, 1>, scalar_prefetch = 0 : i64, scratch_operands = 1 : i64, tpu.core_type = #tpu.core_type<tc>, window_params = [{transform_indices = @transform_0, window_bounds = array<i64: 1>}, {transform_indices = @transform_1, window_bounds = array<i64: 1, 4, 256>}, {transform_indices = @transform_2, window_bounds = array<i64: 1, 4, 4>}]} {
    %c0_i32 = arith.constant 0 : i32
    %0 = arith.cmpi eq, %arg1, %c0_i32 : i32
    %1 = arith.extui %0 : i1 to i32
    %c0_i32_0 = arith.constant 0 : i32
    %2 = arith.cmpi ne, %1, %c0_i32_0 : i32
    scf.if %2 {
      %cst_9 = arith.constant 0.000000e+00 : f32
      %12 = vector.broadcast %cst_9 : f32 to vector<4x4xf32>
      %c0_10 = arith.constant 0 : index
      %c0_11 = arith.constant 0 : index
      %13 = vector.load %arg5[%c0_10, %c0_11] : memref<4x4xf32, #tpu.memory_space<vmem>>, vector<4x4xf32>
      tpu.vector_store %arg5[%c0_10, %c0_11], %12 {strides = array<i32>} : memref<4x4xf32, #tpu.memory_space<vmem>>, vector<4x4xf32>,
    } else {
    }
    %c0 = arith.constant 0 : index
    %c0_1 = arith.constant 0 : index
    %c0_2 = arith.constant 0 : index
    %3 = vector.load %arg3[%c0, %c0_1, %c0_2] : memref<1x4x256xf32, #tpu.memory_space<vmem>>, vector<1x4x256xf32>
    %4 = vector.shape_cast %3 : vector<1x4x256xf32> to vector<4x256xf32>
    %c0_3 = arith.constant 0 : index
    %c0_4 = arith.constant 0 : index
    %5 = vector.load %arg5[%c0_3, %c0_4] : memref<4x4xf32, #tpu.memory_space<vmem>>, vector<4x4xf32>
    %cst = arith.constant dense<0.000000e+00> : vector<4x4xf32>
    %6 = tpu.matmul %4, %4, %cst {dimension_numbers = #tpu.dot_dimension_numbers<[1], [1], [0], [0], [0, 0, 1, 0], [], []>} : vector<4x256xf32>, vector<4x256xf32>, vector<4x4xf32> -> vector<4x4xf32>
    %7 = arith.addf %5, %6 : vector<4x4xf32>
    %c0_5 = arith.constant 0 : index
    %c0_6 = arith.constant 0 : index
    %8 = vector.load %arg5[%c0_5, %c0_6] : memref<4x4xf32, #tpu.memory_space<vmem>>, vector<4x4xf32>
    tpu.vector_store %arg5[%c0_5, %c0_6], %7 {strides = array<i32>} : memref<4x4xf32, #tpu.memory_space<vmem>>, vector<4x4xf32>,
    %c0_i32_7 = arith.constant 0 : i32
    %9 = arith.cmpi eq, %arg1, %c0_i32_7 : i32
    %10 = arith.extui %9 : i1 to i32
    %c0_i32_8 = arith.constant 0 : i32
    %11 = arith.cmpi ne, %10, %c0_i32_8 : i32
    scf.if %11 {
      %c0_9 = arith.constant 0 : index
      %c0_10 = arith.constant 0 : index
      %12 = vector.load %arg5[%c0_9, %c0_10] : memref<4x4xf32, #tpu.memory_space<vmem>>, vector<4x4xf32>
      %cst_11 = arith.constant dense<0x7F800000> : vector<4xf32>
      %13 = vector.multi_reduction <minimumf>, %12, %cst_11 [1] : vector<4x4xf32> to vector<4xf32>
      %14 = vector.shape_cast %13 : vector<4xf32> to vector<4x1xf32>
      %15 = vector.broadcast %14 : vector<4x1xf32> to vector<4x4xf32>
      %16 = arith.subf %15, %12 : vector<4x4xf32>
      %17 = math.exp %16 : vector<4x4xf32>
      %cst_12 = arith.constant dense<0.000000e+00> : vector<4xf32>
      %18 = vector.multi_reduction <add>, %17, %cst_12 [1] : vector<4x4xf32> to vector<4xf32>
      %19 = vector.shape_cast %18 : vector<4xf32> to vector<4x1xf32>
      %20 = vector.broadcast %19 : vector<4x1xf32> to vector<4x4xf32>
      %21 = arith.divf %17, %20 : vector<4x4xf32>
      %c0_13 = arith.constant 0 : index
      %22 = memref.load %arg2[%c0_13] : memref<1xf32, #tpu.memory_space<smem>>
      %23 = vector.broadcast %22 : f32 to vector<4x4xf32>
      %24 = arith.mulf %23, %21 : vector<4x4xf32>
      %c0_14 = arith.constant 0 : index
      %c0_15 = arith.constant 0 : index
      %c0_16 = arith.constant 0 : index
      %25 = vector.load %arg4[%c0_14, %c0_15, %c0_16] : memref<1x4x4xf32, #tpu.memory_space<vmem>>, vector<1x4x4xf32>
      %26 = vector.shape_cast %25 : vector<1x4x4xf32> to vector<4x4xf32>
      %27 = vector.shape_cast %24 : vector<4x4xf32> to vector<1x4x4xf32>
      tpu.vector_store %arg4[%c0_14, %c0_15, %c0_16], %27 {strides = array<i32>} : memref<1x4x4xf32, #tpu.memory_space<vmem>>, vector<1x4x4xf32>,
    } else {
    }
    return
  }
  func.func @transform_0(%arg0: i32, %arg1: i32) -> i32 {
    %c0_i32 = arith.constant 0 : i32
    %c0_i32_0 = arith.constant 0 : i32
    return %c0_i32 : i32
  }
  func.func @transform_1(%arg0: i32, %arg1: i32) -> (i32, i32, i32) {
    %c0_i32 = arith.constant 0 : i32
    %c0_i32_0 = arith.constant 0 : i32
    return %arg0, %c0_i32, %arg1 : i32, i32, i32
  }
  func.func @transform_2(%arg0: i32, %arg1: i32) -> (i32, i32, i32) {
    %c0_i32 = arith.constant 0 : i32
    %c0_i32_0 = arith.constant 0 : i32
    %c0_i32_1 = arith.constant 0 : i32
    return %arg0, %c0_i32, %c0_i32_0 : i32, i32, i32
  }
}

module attributes {stable_mosaic.version = 11 : i64} {
  func.func @_cam_apply_kernel(%arg0: i32, %arg1: i32, %arg2: memref<1x4x4xf32, #tpu.memory_space<vmem>>, %arg3: memref<1x4x256xf32, #tpu.memory_space<vmem>>, %arg4: memref<1x4x256xf32, #tpu.memory_space<vmem>>) attributes {dimension_semantics = [#tpu.dimension_semantics<parallel>, #tpu.dimension_semantics<parallel>], iteration_bounds = array<i64: 2, 1>, scalar_prefetch = 0 : i64, scratch_operands = 0 : i64, tpu.core_type = #tpu.core_type<tc>, window_params = [{transform_indices = @transform_0, window_bounds = array<i64: 1, 4, 4>}, {transform_indices = @transform_1, window_bounds = array<i64: 1, 4, 256>}, {transform_indices = @transform_2, window_bounds = array<i64: 1, 4, 256>}]} {
    %c0 = arith.constant 0 : index
    %c0_0 = arith.constant 0 : index
    %c0_1 = arith.constant 0 : index
    %0 = vector.load %arg3[%c0, %c0_0, %c0_1] : memref<1x4x256xf32, #tpu.memory_space<vmem>>, vector<1x4x256xf32>
    %1 = vector.shape_cast %0 : vector<1x4x256xf32> to vector<4x256xf32>
    %c0_2 = arith.constant 0 : index
    %c0_3 = arith.constant 0 : index
    %c0_4 = arith.constant 0 : index
    %2 = vector.load %arg2[%c0_2, %c0_3, %c0_4] : memref<1x4x4xf32, #tpu.memory_space<vmem>>, vector<1x4x4xf32>
    %3 = vector.shape_cast %2 : vector<1x4x4xf32> to vector<4x4xf32>
    %cst = arith.constant dense<0.000000e+00> : vector<4x256xf32>
    %4 = tpu.matmul %3, %1, %cst {dimension_numbers = #tpu.dot_dimension_numbers<[1], [0], [0], [1], [0, 0, 1, 1], [], []>} : vector<4x4xf32>, vector<4x256xf32>, vector<4x256xf32> -> vector<4x256xf32>
    %5 = arith.addf %4, %1 : vector<4x256xf32>
    %c0_5 = arith.constant 0 : index
    %c0_6 = arith.constant 0 : index
    %c0_7 = arith.constant 0 : index
    %6 = vector.load %arg4[%c0_5, %c0_6, %c0_7] : memref<1x4x256xf32, #tpu.memory_space<vmem>>, vector<1x4x256xf32>
    %7 = vector.shape_cast %6 : vector<1x4x256xf32> to vector<4x256xf32>
    %8 = vector.shape_cast %5 : vector<4x256xf32> to vector<1x4x256xf32>
    tpu.vector_store %arg4[%c0_5, %c0_6, %c0_7], %8 {strides = array<i32>} : memref<1x4x256xf32, #tpu.memory_space<vmem>>, vector<1x4x256xf32>,
    return
  }
  func.func @transform_0(%arg0: i32, %arg1: i32) -> (i32, i32, i32) {
    %c0_i32 = arith.constant 0 : i32
    %c0_i32_0 = arith.constant 0 : i32
    %c0_i32_1 = arith.constant 0 : i32
    return %arg0, %c0_i32, %c0_i32_0 : i32, i32, i32
  }
  func.func @transform_1(%arg0: i32, %arg1: i32) -> (i32, i32, i32) {
    %c0_i32 = arith.constant 0 : i32
    %c0_i32_0 = arith.constant 0 : i32
    return %arg0, %c0_i32, %arg1 : i32, i32, i32
  }
  func.func @transform_2(%arg0: i32, %arg1: i32) -> (i32, i32, i32) {
    %c0_i32 = arith.constant 0 : i32
    %c0_i32_0 = arith.constant 0 : i32
    return %arg0, %c0_i32, %arg1 : i32, i32, i32
  }
}

</mosaic_0001>

<bundles_post_ra>
// kernel: cam_forward.3
= control target key start
LH: loop header
LB: loop body
LE: loop exit
PB: predicated region body
PF: predicated region fallthrough
CT: control target
= control target key end

     0   :  { %s446_s9 = smov 0   ;;  %s448_s10 = smov 0   ;;  %s485_s0 = inlined_call_operand.vmem [shape: f32[2,4,4], index: 0, kind: input, shape index: {}]   ;;  %s486_s1 = inlined_call_operand.vmem [shape: f32[2,4,256], index: 1, kind: input, shape index: {}]   ;;  %s487_s2 = inlined_call_operand.vmem [shape: f32[2,4,256], index: 2, kind: output, shape index: {}]  }
   0x1   :  { %s450_s11 = smov 0  }
   0x2 LB: > { %s24_s12 = sadd.s32 1, %s425_s10  ;;  %p369_p0 = scmp.ge.s32.totalorder %s429_s11, 1  ;;  %s429_s11 = sphi %s450_s11, %s12_s11   ;;  %s425_s10 = sphi %s448_s10, %s489_s10   ;;  %s421_s9 = sphi %s446_s9, %s488_s9  }
   0x3   : > { %p26_p1 = scmp.ge.s32.totalorder %s24_s12, 2  ;;  %p142_p2 = scmp.lt.s32.totalorder %s429_s11, 3 }
   0x5   : > { %s491_s12 = smov (%p26_p1, %s24_s12), 0  ;;  %p143_p3 = pnand %p369_p0, %p142_p2 }
   0x6   : > { %p176_p4 = scmp.lt.s32.totalorder (!%p143_p3), %s421_s9, 1 }
   0x7   : > { %146 = sbr.rel (%p143_p3) target bundleno = 157 (0x9d), region = 28 }
   0xc   : > { %s493_s9 = smov (!%p176_p4, %s421_s9), 1  ;;  %vm215_vm0 = vcmask 1043456   ;;  %vm211_vm1 = vcmask 31744  }
   0xd   : > { %s381_s13 = sshll.u32 %s493_s9, 3  ;;  %s370_s17 = sshll.u32 %s493_s9, 2 }
   0xe   : > { %s188_s16 = scalar_lea.vmem %s486_s1, %s381_s13  ;;  %s179_s20 = scalar_lea.vmem %s485_s0, %s370_s17 }
   0xf   : > { %v200_v0 = vld [vmem:[%s188_s16] sm:$0xff]  ;;  %s198_s23 = scalar_lea.vmem %s487_s2, %s381_s13 }
  0x10   : > { %203 = vst [vmem:[#allocation1] ss:$2 sm:$0xff] %v200_v0  ;;  %v201_v1 = vld [vmem:[%s179_s20] sm:$0xf] }
  0x17   : > { %v205_v2 = vld.sshfl [vmem:[#allocation1 + $0x8] sm:$0xff pattern:$0x75316420]  ;;  %v204_v3 = vld.sshfl [vmem:[#allocation1] sm:$0xff pattern:$0x75316420] }
  0x18   : > { %377 = vmatpush.msk.msra.mxu1 %vm215_vm0, %v205_v2  ;;  %206 = vst [vmem:[#allocation1] ss:$2 sm:$0xff] %v200_v0  ;;  %375 = vmatpush.msk.msra.mxu0 %vm215_vm0, %v204_v3 }
  0x19   : > { %378 = vmatmul.msk.f32.vlgmr.msra.gmra.mxu1 %vm211_vm1, %v201_v1  ;;  %376 = vmatmul.msk.f32.vlgmr.msra.gmra.mxu0 %vm211_vm1, %v201_v1 }
  0x1f   : > { %v208_v4 = vld.sshfl [vmem:[#allocation1 + $0x8] sm:$0xff pattern:$0x75316420]  ;;  %v207_v5 = vld.sshfl [vmem:[#allocation1] sm:$0xff pattern:$0x75316420] }
  0x96   : > { %v257_v6 = vpop.f32.mrf.mxu1  ;;  %v237_v7 = vpop.f32.mrf.mxu0 }
  0x97   : > { %v258_v8 = vadd.f32 %v257_v6, %v208_v4  ;;  %v238_v9 = vadd.f32 %v237_v7, %v207_v5 }
  0x99   : > { %v262_v10 = vrot.slane %v258_v8, 4 }
  0x9b   : > { %v263_v11 = vsel %vm215_vm0, %v238_v9, %v262_v10 }
  0x9c   : > { %265 = vst [vmem:[%s198_s23] sm:$0xff] %v263_v11 }
  0x9d PF: > { %s12_s11 = sadd.s32 1, %s429_s11   ;;  %s488_s9 = smov %s425_s10 }
  0x9e   : > { %p9_p5 = scmp.ge.s32.totalorder %s12_s11, 4   ;;  %s489_s10 = smov %s491_s12 }
  0xa0   :  { %11 = sbr.rel (!%p9_p5) target bundleno = 2 (0x2), region = 61 }

// kernel: cam_forward.2
= control target key start
LH: loop header
LB: loop body
LE: loop exit
PB: predicated region body
PF: predicated region fallthrough
CT: control target
= control target key end

     0   :  { %s415_s11 = smov 0   ;;  %s417_s12 = smov 0   ;;  %s457_s0 = inlined_call_operand.<no memory space> [shape: f32[1], index: 0, kind: input, shape index: {}]   ;;  %s458_s1 = inlined_call_operand.vmem [shape: f32[2,4,256], index: 1, kind: input, shape index: {}]   ;;  %s459_s2 = inlined_call_operand.vmem [shape: f32[2,4,4], index: 2, kind: output, shape index: {}]  }
   0x1   :  { %7 = sst [smem:[#allocation3]] %s457_s0  ;;  %s419_s13 = smov 0  }
   0x2 LB: > { %s25_s0 = sadd.s32 1, %s390_s12  ;;  %p336_p0 = scmp.ge.s32.totalorder %s394_s13, 1  ;;  %s394_s13 = sphi %s419_s13, %s13_s13   ;;  %s390_s12 = sphi %s417_s12, %s461_s12   ;;  %s386_s11 = sphi %s415_s11, %s460_s11  }
   0x3   : > { %p27_p1 = scmp.ge.s32.totalorder %s25_s0, 2  ;;  %p132_p2 = scmp.lt.s32.totalorder %s394_s13, 3 }
   0x5   : > { %s463_s0 = smov (%p27_p1, %s25_s0), 0  ;;  %p133_p3 = pnand %p336_p0, %p132_p2 }
   0x6   : > { %p158_p4 = scmp.lt.s32.totalorder (!%p133_p3), %s386_s11, 1  ;;  %s261_s18 = sld [smem:[#allocation3]] (!%p133_p3) }
   0x7   : > { %136 = sbr.rel (%p133_p3) target bundleno = 440 (0x1b8), region = 28 }
   0xc   : > { %s465_s11 = smov (!%p158_p4, %s386_s11), 1  ;;  %vm175_vm0 = vcmask 27648   ;;  %v396_v5 = vmov 0.0   ;;  %v262_v28 = vstv %s261_s18 }
   0xd   : > { %s342_s14 = sshll.u32 %s465_s11, 3  ;;  %176 = vst.msk [vmem:[#allocation2] sm:$0xf] %vm175_vm0, %v396_v5  ;;  %s339_s19 = sshll.u32 %s465_s11, 2 }
   0xe   : > { %s165_s17 = scalar_lea.vmem %s458_s1, %s342_s14  ;;  %s170_s22 = scalar_lea.vmem %s459_s2, %s339_s19 }
   0xf   : > { %v177_v0 = vld [vmem:[%s165_s17] sm:$0xff] }
  0x10   : > { %180 = vst [vmem:[#allocation1] ss:$2 sm:$0xff] %v177_v0 }
  0x14   : > { %v178_v7 = vld [vmem:[#allocation2] sm:$0xf] }
  0x17   : > { %v181_v1 = vld.sshfl [vmem:[#allocation1] sm:$0xff pattern:$0x75316420]  ;;  %v182_v2 = vld.sshfl [vmem:[#allocation1 + $0x8] sm:$0xff pattern:$0x75316420] }
  0x18   : > { %185 = vst [vmem:[#allocation1] ss:$2 sm:$0xff] %v177_v0 }
  0x1f   : > { %v186_v3 = vld.sshfl [vmem:[#allocation1] sm:$0xff pattern:$0x75316420]  ;;  %v187_v4 = vld.sshfl [vmem:[#allocation1 + $0x8] sm:$0xff pattern:$0x75316420] }
  0x20   : > { %205 = vmatpush.xpose.msra.mxu0 %v186_v3  ;;  %225 = vmatpush.xpose.msra.mxu1 %v187_v4 }
  0x23   : > { %206 = vmatmul.f32.vlgmr.msra.gmra.mxu0 %v181_v1  ;;  %226 = vmatmul.f32.vlgmr.msra.gmra.mxu1 %v182_v2 }
  0xa0   : > { %v207_v6 = vpop.f32.mrf.mxu0  ;;  %v227_v8 = vpop.f32.mrf.mxu1 }
  0xa1   : > { %v228_v9 = vadd.f32 %v227_v8, %v207_v6 }
  0xa3   : > { %v230_v10 = vadd.f32 %v228_v9, %v178_v7 }
  0xa5   : > { %232 = vst.msk [vmem:[#allocation2] sm:$0xf] %vm175_vm0, %v230_v10 }
  0xac   : > { %v236_v11 = vld [vmem:[#allocation2] sm:$0xf] }
  0xad   : > { %v237_v12 = vsel %vm175_vm0, %v236_v11, inf }
  0xae   : > { %238 = vmin.xlane.f32.xlu0 %v237_v12 }
 0x121   : > { %v239_v13 = vpop.xlane.xlu0 %238 }
 0x122   : > { %v240_v14 = vsub.f32 %v239_v13, %v236_v11 }
 0x124   : > { %v241_v15 = vmul.f32 1.442695, %v240_v14 }
 0x126   : > { %368 = vpow2.f32 %v241_v15 }
 0x12c   : > { %v369_v16 = vpop.eup %368 }
 0x12d   : > { %v243_v17 = vsel %vm175_vm0, %v369_v16, 0.0 }
 0x12e   : > { %244 = vadd.xlane.f32.xlu0 %v243_v17 }
 0x1a1   : > { %v245_v18 = vpop.xlane.xlu0 %244 }
 0x1a2   : > { %370 = vrcp.f32 %v245_v18  ;;  %v257_v22 = vand.u32 2147483648, %v245_v18  ;;  %v255_v24 = vand.u32 2147483647, %v245_v18  ;;  %vm251_vm2 = vweird.f32 %v245_v18 }
 0x1a4   : > { %v258_v26 = vor.u32 1.1754944e-38, %v257_v22  ;;  %vm256_vm4 = vcmp.eq.f32.partialorder %v255_v24, 8.507059e+37 }
 0x1a8   : > { %v371_v19 = vpop.eup %370 }
 0x1a9   : > { %v247_v20 = vmul.f32 %v371_v19, %v245_v18  ;;  %vm252_vm1 = vweird.f32 %v371_v19 }
 0x1aa   : > { %vm253_vm3 = vmor %vm251_vm2, %vm252_vm1 }
 0x1ab   : > { %v248_v21 = vsub.f32 1.0, %v247_v20 }
 0x1ad   : > { %v249_v23 = vmul.f32 %v371_v19, %v248_v21 }
 0x1af   : > { %v250_v25 = vadd.f32 %v371_v19, %v249_v23 }
 0x1b1   : > { %v254_v27 = vsel %vm253_vm3, %v371_v19, %v250_v25 }
 0x1b2   : > { %v259_v29 = vsel %vm256_vm4, %v258_v26, %v254_v27 }
 0x1b3   : > { %v260_v30 = vmul.f32 %v369_v16, %v259_v29 }
 0x1b5   : > { %v263_v31 = vmul.f32 %v262_v28, %v260_v30 }
 0x1b7   : > { %264 = vst.msk [vmem:[%s170_s22] sm:$0xf] %vm175_vm0, %v263_v31 }
 0x1b8 PF: > { %s13_s13 = sadd.s32 1, %s394_s13   ;;  %s460_s11 = smov %s390_s12 }
 0x1b9   : > { %p10_p5 = scmp.ge.s32.totalorder %s13_s13, 4   ;;  %s461_s12 = smov %s463_s0 }
 0x1bb   :  { %12 = sbr.rel (!%p10_p5) target bundleno = 2 (0x2), region = 66 }

</bundles_post_ra>
